<compile_context>
chip_gen: v7x
topology: tpu7x:2x2x1
jax: 0.10.0
libtpu: 0.0.40
codegen_flags: <defaults>
</compile_context>

<pallas_src>
import functools

import jax
import jax.numpy as jnp
from jax import lax
from jax.experimental import pallas as pl
from jax.experimental.pallas import tpu as pltpu

_BIG = 9999999.0 ** 2  # sentinel on squared distances; sqrt(_BIG) ~ torch's 9999999 mask


def _soft_triplet_kernel(e1_ref, e2_ref, sq1c_ref, sq1r_ref, sq2c_ref, sq2r_ref,
                         labc_ref, labr_ref, o_ref, *, margin, tm, n):
    blk = pl.program_id(0)
    row0 = pl.multiple_of(blk * tm, tm)

    # Block rows sliced from the resident full arrays (no duplicate HBM input).
    e1_blk = e1_ref[pl.ds(row0, tm), :]                       # (tm, D) native dtype
    sq1c = sq1c_ref[pl.ds(row0, tm), :]                       # (tm, 1) f32
    labc = labc_ref[pl.ds(row0, tm), :]                       # (tm, 1) i32
    sq1r = sq1r_ref[...]                                      # (1, n) f32
    labr = labr_ref[...]                                      # (1, n) i32

    # Gram block on the MXU in native dtype, f32 accumulate.
    g1 = lax.dot_general(e1_blk, e1_ref[...], (((1,), (1,)), ((), ())),
                         preferred_element_type=jnp.float32)  # (tm, n)
    d2 = sq1c + sq1r - 2.0 * g1                               # squared pairwise distances

    sim = labc == labr                                        # (tm, n) bool
    cols = lax.broadcasted_iota(jnp.int32, (tm, n), 1)

    # --- _batch_hard on squared distances (sqrt deferred to (tm,1) vectors) ---
    pos = jnp.where(sim, d2, -_BIG)
    neg = jnp.where(sim, _BIG, d2)
    hard_p2 = jnp.max(pos, axis=1, keepdims=True)             # (tm, 1)
    hard_n2 = jnp.min(neg, axis=1, keepdims=True)             # (tm, 1)
    ap_idx = jnp.min(jnp.where(pos == hard_p2, cols, n), axis=1, keepdims=True)
    an_idx = jnp.min(jnp.where(neg == hard_n2, cols, n), axis=1, keepdims=True)

    hard_p = jnp.sqrt(jnp.maximum(hard_p2, 1e-12))            # clamp+sqrt on (tm,1) only
    hard_n = jnp.sqrt(jnp.maximum(hard_n2, 1e-12))

    # --- log_softmax over the (dist_ap, dist_an) pair ---
    m = jnp.maximum(hard_p, hard_n)
    lse = m + jnp.log(jnp.exp(hard_p - m) + jnp.exp(hard_n - m))
    log_p = hard_p - lse
    log_n = hard_n - lse

    if margin is not None:
        o_ref[...] = -margin * log_p - (1.0 - margin) * log_n
        return

    # --- soft targets from emb2 squared distances at the mined indices ---
    e2_blk = e2_ref[pl.ds(row0, tm), :]
    sq2c = sq2c_ref[pl.ds(row0, tm), :]
    sq2r = sq2r_ref[...]
    g2 = lax.dot_general(e2_blk, e2_ref[...], (((1,), (1,)), ((), ())),
                         preferred_element_type=jnp.float32)
    d2_ref = sq2c + sq2r - 2.0 * g2                           # (tm, n), no sqrt

    rp2 = jnp.sum(jnp.where(cols == ap_idx, d2_ref, 0.0), axis=1, keepdims=True)
    rn2 = jnp.sum(jnp.where(cols == an_idx, d2_ref, 0.0), axis=1, keepdims=True)
    rp = jnp.sqrt(jnp.maximum(rp2, 1e-12))
    rn = jnp.sqrt(jnp.maximum(rn2, 1e-12))

    m2 = jnp.maximum(rp, rn)
    ep = jnp.exp(rp - m2)
    en = jnp.exp(rn - m2)
    denom = ep + en
    sp = ep / denom                                           # softmax targets (detached)
    sn = en / denom

    o_ref[...] = -(sp * log_p + sn * log_n)                   # per-sample loss (tm, 1)


def _choose_tm(n):
    """Row-block size: full N for small batches, else largest multiple-of-8 divisor <= 256."""
    if n <= 256:
        return n
    for tm in range(256, 7, -8):
        if n % tm == 0:
            return tm
    return n


def soft_triplet_loss(emb1, emb2, label, margin=None, normalize_feature=False):
    """JAX/Pallas equivalent of SoftTripletLoss(margin, normalize_feature)(emb1, emb2, label)."""
    if normalize_feature:
        emb1 = emb1 / jnp.maximum(jnp.linalg.norm(emb1.astype(jnp.float32),
                                                  axis=1, keepdims=True), 1e-12).astype(emb1.dtype)
        emb2 = emb2 / jnp.maximum(jnp.linalg.norm(emb2.astype(jnp.float32),
                                                  axis=1, keepdims=True), 1e-12).astype(emb2.dtype)

    N, D = emb1.shape
    tm = _choose_tm(N)
    grid = (N // tm,)

    # Squared norms precomputed once (f32), passed in both (N,1) and (1,N) layouts so the
    # kernel never needs a transpose or a Gram-diagonal extraction.
    sq1 = jnp.sum(jnp.square(emb1.astype(jnp.float32)), axis=1)
    sq2 = jnp.sum(jnp.square(emb2.astype(jnp.float32)), axis=1)
    lab = label.astype(jnp.int32)

    # VMEM budget: resident embeddings + ~a dozen live (tm, N) f32 slabs + headroom.
    esz = jnp.dtype(emb1.dtype).itemsize
    est = 2 * (2 * N * D * esz) + 12 * tm * N * 4 + (4 << 20)
    vmem_limit = int(min(max(est, 32 * 1024 * 1024), 128 * 1024 * 1024))

    kernel = functools.partial(_soft_triplet_kernel, margin=margin, tm=tm, n=N)
    per_sample = pl.pallas_call(
        kernel,
        out_shape=jax.ShapeDtypeStruct((N, 1), jnp.float32),
        grid=grid,
        in_specs=[
            pl.BlockSpec((N, D), lambda i: (0, 0)),   # emb1 (resident)
            pl.BlockSpec((N, D), lambda i: (0, 0)),   # emb2 (resident)
            pl.BlockSpec((N, 1), lambda i: (0, 0)),   # ||emb1||^2 column
            pl.BlockSpec((1, N), lambda i: (0, 0)),   # ||emb1||^2 row
            pl.BlockSpec((N, 1), lambda i: (0, 0)),   # ||emb2||^2 column
            pl.BlockSpec((1, N), lambda i: (0, 0)),   # ||emb2||^2 row
            pl.BlockSpec((N, 1), lambda i: (0, 0)),   # labels column
            pl.BlockSpec((1, N), lambda i: (0, 0)),   # labels row
        ],
        out_specs=pl.BlockSpec((tm, 1), lambda i: (i, 0)),
        compiler_params=pltpu.CompilerParams(
            dimension_semantics=("parallel",),
            vmem_limit_bytes=vmem_limit,
        ),
    )(emb1, emb2,
      sq1.reshape(N, 1), sq1.reshape(1, N),
      sq2.reshape(N, 1), sq2.reshape(1, N),
      lab.reshape(N, 1), lab.reshape(1, N))

    return jnp.mean(per_sample)   # == (-ref * log_softmax).mean(0).sum()  /  margin .mean()


def _reference(emb1, emb2, label, margin=None):
    """Pure-JAX transcription of the PyTorch forward for checking."""
    def edist(x, y):
        xx = jnp.sum(x * x, axis=1, keepdims=True)
        yy = jnp.sum(y * y, axis=1, keepdims=True).T
        d = xx + yy - 2.0 * x @ y.T
        return jnp.sqrt(jnp.maximum(d, 1e-12))

    N = emb1.shape[0]
    mat_dist = edist(emb1, emb1)
    mat_sim = (label[:, None] == label[None, :]).astype(jnp.float32)
    pos = mat_dist + (-9999999.0) * (1.0 - mat_sim)
    hard_p = jnp.max(pos, axis=1)
    ap = jnp.argmax(pos, axis=1)
    neg = mat_dist + 9999999.0 * mat_sim
    hard_n = jnp.min(neg, axis=1)
    an = jnp.argmin(neg, axis=1)
    td = jax.nn.log_softmax(jnp.stack([hard_p, hard_n], axis=1), axis=1)
    if margin is not None:
        return jnp.mean(-margin * td[:, 0] - (1.0 - margin) * td[:, 1])
    mat_dist_ref = edist(emb2, emb2)
    rp = mat_dist_ref[jnp.arange(N), ap]
    rn = mat_dist_ref[jnp.arange(N), an]
    tdr = jax.nn.softmax(jnp.stack([rp, rn], axis=1), axis=1)
    return jnp.sum(jnp.mean(-tdr * td, axis=0))


if __name__ == "__main__":
    key = jax.random.PRNGKey(0)
    k1, k2 = jax.random.split(key)
    N, D = 8, 32
    emb1 = jax.random.normal(k1, (N, D), dtype=jnp.float32)
    emb2 = jax.random.normal(k2, (N, D), dtype=jnp.float32)
    # 4 identity classes, 2 samples each (every sample has a positive and a negative)
    label = jnp.array([0, 0, 1, 1, 2, 2, 3, 3], dtype=jnp.int32)

    # default path (margin=None)
    loss = jax.block_until_ready(soft_triplet_loss(emb1, emb2, label))
    ref = _reference(emb1, emb2, label)
    assert jnp.allclose(loss, ref, atol=1e-5, rtol=1e-5), (loss, ref)

    # margin path
    loss_m = jax.block_until_ready(soft_triplet_loss(emb1, emb2, label, margin=0.3))
    ref_m = _reference(emb1, emb2, label, margin=0.3)
    assert jnp.allclose(loss_m, ref_m, atol=1e-5, rtol=1e-5), (loss_m, ref_m)

    # normalize_feature path
    loss_n = jax.block_until_ready(
        soft_triplet_loss(emb1, emb2, label, normalize_feature=True))
    assert jnp.isfinite(loss_n)

    print("KERNEL_OK")
</pallas_src>

<mosaic_0001>
module attributes {stable_mosaic.version = 11 : i64} {
  func.func @_soft_triplet_kernel(%arg0: i32, %arg1: memref<8x32xf32, #tpu.memory_space<vmem>>, %arg2: memref<8x32xf32, #tpu.memory_space<vmem>>, %arg3: memref<8x1xf32, #tpu.memory_space<vmem>>, %arg4: memref<1x8xf32, #tpu.memory_space<vmem>>, %arg5: memref<8x1xf32, #tpu.memory_space<vmem>>, %arg6: memref<1x8xf32, #tpu.memory_space<vmem>>, %arg7: memref<8x1xi32, #tpu.memory_space<vmem>>, %arg8: memref<1x8xi32, #tpu.memory_space<vmem>>, %arg9: memref<8x1xf32, #tpu.memory_space<vmem>>) attributes {dimension_semantics = [#tpu.dimension_semantics<parallel>], iteration_bounds = array<i64: 1>, scalar_prefetch = 0 : i64, scratch_operands = 0 : i64, tpu.core_type = #tpu.core_type<tc>, window_params = [{pipeline_mode = #tpu.pipeline_mode<synchronous>, transform_indices = @transform_0, window_bounds = array<i64: 8, 32>}, {pipeline_mode = #tpu.pipeline_mode<synchronous>, transform_indices = @transform_1, window_bounds = array<i64: 8, 32>}, {pipeline_mode = #tpu.pipeline_mode<synchronous>, transform_indices = @transform_2, window_bounds = array<i64: 8, 1>}, {pipeline_mode = #tpu.pipeline_mode<synchronous>, transform_indices = @transform_3, window_bounds = array<i64: 1, 8>}, {pipeline_mode = #tpu.pipeline_mode<synchronous>, transform_indices = @transform_4, window_bounds = array<i64: 8, 1>}, {pipeline_mode = #tpu.pipeline_mode<synchronous>, transform_indices = @transform_5, window_bounds = array<i64: 1, 8>}, {pipeline_mode = #tpu.pipeline_mode<synchronous>, transform_indices = @transform_6, window_bounds = array<i64: 8, 1>}, {pipeline_mode = #tpu.pipeline_mode<synchronous>, transform_indices = @transform_7, window_bounds = array<i64: 1, 8>}, {transform_indices = @transform_8, window_bounds = array<i64: 8, 1>}]} {
    %c8_i32 = arith.constant 8 : i32
    %0 = arith.muli %arg0, %c8_i32 : i32
    %1 = tpu.assume_multiple %0, 8 : i32
    %2 = arith.index_cast %1 : i32 to index
    %c0 = arith.constant 0 : index
    %3 = vector.load %arg1[%2, %c0] : memref<8x32xf32, #tpu.memory_space<vmem>>, vector<8x32xf32>
    %4 = arith.index_cast %1 : i32 to index
    %c0_0 = arith.constant 0 : index
    %5 = vector.load %arg3[%4, %c0_0] : memref<8x1xf32, #tpu.memory_space<vmem>>, vector<8x1xf32>
    %6 = arith.index_cast %1 : i32 to index
    %c0_1 = arith.constant 0 : index
    %7 = vector.load %arg7[%6, %c0_1] : memref<8x1xi32, #tpu.memory_space<vmem>>, vector<8x1xi32>
    %c0_2 = arith.constant 0 : index
    %c0_3 = arith.constant 0 : index
    %8 = vector.load %arg4[%c0_2, %c0_3] : memref<1x8xf32, #tpu.memory_space<vmem>>, vector<1x8xf32>
    %c0_4 = arith.constant 0 : index
    %c0_5 = arith.constant 0 : index
    %9 = vector.load %arg8[%c0_4, %c0_5] : memref<1x8xi32, #tpu.memory_space<vmem>>, vector<1x8xi32>
    %c0_6 = arith.constant 0 : index
    %c0_7 = arith.constant 0 : index
    %10 = vector.load %arg1[%c0_6, %c0_7] : memref<8x32xf32, #tpu.memory_space<vmem>>, vector<8x32xf32>
    %cst = arith.constant dense<0.000000e+00> : vector<8x8xf32>
    %11 = tpu.matmul %3, %10, %cst {dimension_numbers = #tpu.dot_dimension_numbers<[1], [1], [0], [0], [0, 0, 1, 0], [], []>} : vector<8x32xf32>, vector<8x32xf32>, vector<8x8xf32> -> vector<8x8xf32>
    %12 = vector.broadcast %5 : vector<8x1xf32> to vector<8x8xf32>
    %13 = vector.broadcast %8 : vector<1x8xf32> to vector<8x8xf32>
    %14 = arith.addf %12, %13 : vector<8x8xf32>
    %cst_8 = arith.constant 2.000000e+00 : f32
    %15 = vector.broadcast %cst_8 : f32 to vector<8x8xf32>
    %16 = arith.mulf %15, %11 : vector<8x8xf32>
    %17 = arith.subf %14, %16 : vector<8x8xf32>
    %18 = vector.broadcast %7 : vector<8x1xi32> to vector<8x8xi32>
    %19 = vector.broadcast %9 : vector<1x8xi32> to vector<8x8xi32>
    %20 = arith.cmpi eq, %18, %19 : vector<8x8xi32>
    %21 = tpu.iota {dimensions = array<i32: 1>} : vector<8x8xi32>
    %cst_9 = arith.constant -9.99999835E+13 : f32
    %22 = vector.broadcast %cst_9 : f32 to vector<8x8xf32>
    %23 = arith.select %20, %17, %22 : vector<8x8xi1>, vector<8x8xf32>
    %cst_10 = arith.constant 9.99999835E+13 : f32
    %24 = vector.broadcast %cst_10 : f32 to vector<8x8xf32>
    %25 = arith.select %20, %24, %17 : vector<8x8xi1>, vector<8x8xf32>
    %cst_11 = arith.constant dense<0xFF800000> : vector<8xf32>
    %26 = vector.multi_reduction <maximumf>, %23, %cst_11 [1] : vector<8x8xf32> to vector<8xf32>
    %27 = vector.shape_cast %26 : vector<8xf32> to vector<8x1xf32>
    %cst_12 = arith.constant dense<0x7F800000> : vector<8xf32>
    %28 = vector.multi_reduction <minimumf>, %25, %cst_12 [1] : vector<8x8xf32> to vector<8xf32>
    %29 = vector.shape_cast %28 : vector<8xf32> to vector<8x1xf32>
    %30 = vector.broadcast %27 : vector<8x1xf32> to vector<8x8xf32>
    %31 = arith.cmpf oeq, %23, %30 : vector<8x8xf32>
    %c8_i32_13 = arith.constant 8 : i32
    %32 = vector.broadcast %c8_i32_13 : i32 to vector<8x8xi32>
    %33 = arith.select %31, %21, %32 : vector<8x8xi1>, vector<8x8xi32>
    %cst_14 = arith.constant dense<2147483647> : vector<8xi32>
    %34 = vector.multi_reduction <minsi>, %33, %cst_14 [1] : vector<8x8xi32> to vector<8xi32>
    %35 = vector.shape_cast %34 : vector<8xi32> to vector<8x1xi32>
    %36 = vector.broadcast %29 : vector<8x1xf32> to vector<8x8xf32>
    %37 = arith.cmpf oeq, %25, %36 : vector<8x8xf32>
    %c8_i32_15 = arith.constant 8 : i32
    %38 = vector.broadcast %c8_i32_15 : i32 to vector<8x8xi32>
    %39 = arith.select %37, %21, %38 : vector<8x8xi1>, vector<8x8xi32>
    %cst_16 = arith.constant dense<2147483647> : vector<8xi32>
    %40 = vector.multi_reduction <minsi>, %39, %cst_16 [1] : vector<8x8xi32> to vector<8xi32>
    %41 = vector.shape_cast %40 : vector<8xi32> to vector<8x1xi32>
    %cst_17 = arith.constant 9.99999996E-13 : f32
    %42 = vector.broadcast %cst_17 : f32 to vector<8x1xf32>
    %43 = arith.maximumf %27, %42 : vector<8x1xf32>
    %44 = math.sqrt %43 : vector<8x1xf32>
    %cst_18 = arith.constant 9.99999996E-13 : f32
    %45 = vector.broadcast %cst_18 : f32 to vector<8x1xf32>
    %46 = arith.maximumf %29, %45 : vector<8x1xf32>
    %47 = math.sqrt %46 : vector<8x1xf32>
    %48 = arith.maximumf %44, %47 : vector<8x1xf32>
    %49 = arith.subf %44, %48 : vector<8x1xf32>
    %50 = math.exp %49 : vector<8x1xf32>
    %51 = arith.subf %47, %48 : vector<8x1xf32>
    %52 = math.exp %51 : vector<8x1xf32>
    %53 = arith.addf %50, %52 : vector<8x1xf32>
    %54 = math.log %53 : vector<8x1xf32>
    %55 = arith.addf %48, %54 : vector<8x1xf32>
    %56 = arith.subf %44, %55 : vector<8x1xf32>
    %57 = arith.subf %47, %55 : vector<8x1xf32>
    %58 = arith.index_cast %1 : i32 to index
    %c0_19 = arith.constant 0 : index
    %59 = vector.load %arg2[%58, %c0_19] : memref<8x32xf32, #tpu.memory_space<vmem>>, vector<8x32xf32>
    %60 = arith.index_cast %1 : i32 to index
    %c0_20 = arith.constant 0 : index
    %61 = vector.load %arg5[%60, %c0_20] : memref<8x1xf32, #tpu.memory_space<vmem>>, vector<8x1xf32>
    %c0_21 = arith.constant 0 : index
    %c0_22 = arith.constant 0 : index
    %62 = vector.load %arg6[%c0_21, %c0_22] : memref<1x8xf32, #tpu.memory_space<vmem>>, vector<1x8xf32>
    %c0_23 = arith.constant 0 : index
    %c0_24 = arith.constant 0 : index
    %63 = vector.load %arg2[%c0_23, %c0_24] : memref<8x32xf32, #tpu.memory_space<vmem>>, vector<8x32xf32>
    %cst_25 = arith.constant dense<0.000000e+00> : vector<8x8xf32>
    %64 = tpu.matmul %59, %63, %cst_25 {dimension_numbers = #tpu.dot_dimension_numbers<[1], [1], [0], [0], [0, 0, 1, 0], [], []>} : vector<8x32xf32>, vector<8x32xf32>, vector<8x8xf32> -> vector<8x8xf32>
    %65 = vector.broadcast %61 : vector<8x1xf32> to vector<8x8xf32>
    %66 = vector.broadcast %62 : vector<1x8xf32> to vector<8x8xf32>
    %67 = arith.addf %65, %66 : vector<8x8xf32>
    %cst_26 = arith.constant 2.000000e+00 : f32
    %68 = vector.broadcast %cst_26 : f32 to vector<8x8xf32>
    %69 = arith.mulf %68, %64 : vector<8x8xf32>
    %70 = arith.subf %67, %69 : vector<8x8xf32>
    %71 = vector.broadcast %35 : vector<8x1xi32> to vector<8x8xi32>
    %72 = arith.cmpi eq, %21, %71 : vector<8x8xi32>
    %cst_27 = arith.constant 0.000000e+00 : f32
    %73 = vector.broadcast %cst_27 : f32 to vector<8x8xf32>
    %74 = arith.select %72, %70, %73 : vector<8x8xi1>, vector<8x8xf32>
    %cst_28 = arith.constant dense<0.000000e+00> : vector<8xf32>
    %75 = vector.multi_reduction <add>, %74, %cst_28 [1] : vector<8x8xf32> to vector<8xf32>
    %76 = vector.shape_cast %75 : vector<8xf32> to vector<8x1xf32>
    %77 = vector.broadcast %41 : vector<8x1xi32> to vector<8x8xi32>
    %78 = arith.cmpi eq, %21, %77 : vector<8x8xi32>
    %cst_29 = arith.constant 0.000000e+00 : f32
    %79 = vector.broadcast %cst_29 : f32 to vector<8x8xf32>
    %80 = arith.select %78, %70, %79 : vector<8x8xi1>, vector<8x8xf32>
    %cst_30 = arith.constant dense<0.000000e+00> : vector<8xf32>
    %81 = vector.multi_reduction <add>, %80, %cst_30 [1] : vector<8x8xf32> to vector<8xf32>
    %82 = vector.shape_cast %81 : vector<8xf32> to vector<8x1xf32>
    %cst_31 = arith.constant 9.99999996E-13 : f32
    %83 = vector.broadcast %cst_31 : f32 to vector<8x1xf32>
    %84 = arith.maximumf %76, %83 : vector<8x1xf32>
    %85 = math.sqrt %84 : vector<8x1xf32>
    %cst_32 = arith.constant 9.99999996E-13 : f32
    %86 = vector.broadcast %cst_32 : f32 to vector<8x1xf32>
    %87 = arith.maximumf %82, %86 : vector<8x1xf32>
    %88 = math.sqrt %87 : vector<8x1xf32>
    %89 = arith.maximumf %85, %88 : vector<8x1xf32>
    %90 = arith.subf %85, %89 : vector<8x1xf32>
    %91 = math.exp %90 : vector<8x1xf32>
    %92 = arith.subf %88, %89 : vector<8x1xf32>
    %93 = math.exp %92 : vector<8x1xf32>
    %94 = arith.addf %91, %93 : vector<8x1xf32>
    %95 = arith.divf %91, %94 : vector<8x1xf32>
    %96 = arith.divf %93, %94 : vector<8x1xf32>
    %97 = arith.mulf %95, %56 : vector<8x1xf32>
    %98 = arith.mulf %96, %57 : vector<8x1xf32>
    %99 = arith.addf %97, %98 : vector<8x1xf32>
    %cst_33 = arith.constant 0.000000e+00 : f32
    %100 = vector.broadcast %cst_33 : f32 to vector<8x1xf32>
    %101 = arith.subf %100, %99 : vector<8x1xf32>
    %c0_34 = arith.constant 0 : index
    %c0_35 = arith.constant 0 : index
    %102 = vector.load %arg9[%c0_34, %c0_35] : memref<8x1xf32, #tpu.memory_space<vmem>>, vector<8x1xf32>
    tpu.vector_store %arg9[%c0_34, %c0_35], %101 {strides = array<i32>} : memref<8x1xf32, #tpu.memory_space<vmem>>, vector<8x1xf32>,
    return
  }
  func.func @transform_0(%arg0: i32) -> (i32, i32) {
    %c0_i32 = arith.constant 0 : i32
    %c0_i32_0 = arith.constant 0 : i32
    %c0_i32_1 = arith.constant 0 : i32
    return %c0_i32, %c0_i32_0 : i32, i32
  }
  func.func @transform_1(%arg0: i32) -> (i32, i32) {
    %c0_i32 = arith.constant 0 : i32
    %c0_i32_0 = arith.constant 0 : i32
    %c0_i32_1 = arith.constant 0 : i32
    return %c0_i32, %c0_i32_0 : i32, i32
  }
  func.func @transform_2(%arg0: i32) -> (i32, i32) {
    %c0_i32 = arith.constant 0 : i32
    %c0_i32_0 = arith.constant 0 : i32
    %c0_i32_1 = arith.constant 0 : i32
    return %c0_i32, %c0_i32_0 : i32, i32
  }
  func.func @transform_3(%arg0: i32) -> (i32, i32) {
    %c0_i32 = arith.constant 0 : i32
    %c0_i32_0 = arith.constant 0 : i32
    %c0_i32_1 = arith.constant 0 : i32
    return %c0_i32, %c0_i32_0 : i32, i32
  }
  func.func @transform_4(%arg0: i32) -> (i32, i32) {
    %c0_i32 = arith.constant 0 : i32
    %c0_i32_0 = arith.constant 0 : i32
    %c0_i32_1 = arith.constant 0 : i32
    return %c0_i32, %c0_i32_0 : i32, i32
  }
  func.func @transform_5(%arg0: i32) -> (i32, i32) {
    %c0_i32 = arith.constant 0 : i32
    %c0_i32_0 = arith.constant 0 : i32
    %c0_i32_1 = arith.constant 0 : i32
    return %c0_i32, %c0_i32_0 : i32, i32
  }
  func.func @transform_6(%arg0: i32) -> (i32, i32) {
    %c0_i32 = arith.constant 0 : i32
    %c0_i32_0 = arith.constant 0 : i32
    %c0_i32_1 = arith.constant 0 : i32
    return %c0_i32, %c0_i32_0 : i32, i32
  }
  func.func @transform_7(%arg0: i32) -> (i32, i32) {
    %c0_i32 = arith.constant 0 : i32
    %c0_i32_0 = arith.constant 0 : i32
    %c0_i32_1 = arith.constant 0 : i32
    return %c0_i32, %c0_i32_0 : i32, i32
  }
  func.func @transform_8(%arg0: i32) -> (i32, i32) {
    %c0_i32 = arith.constant 0 : i32
    %c0_i32_0 = arith.constant 0 : i32
    return %arg0, %c0_i32 : i32, i32
  }
}

</mosaic_0001>

<bundles_post_ra>
// kernel: tpu_custom_call.1
= control target key start
LH: loop header
LB: loop body
LE: loop exit
PB: predicated region body
PF: predicated region fallthrough
CT: control target
= control target key end

     0   :  { %vm39_vm0 = vcmask 261120   ;;  %v401_v0 = vmov 0.0   ;;  %vm402_vm1 = vmmov 0   ;;  %v403_v3 = vmov 0   ;;  %s486_s0 = inlined_call_operand.vmem [shape: f32[8,32], index: 0, kind: input, shape index: {}]   ;;  %s487_s2 = inlined_call_operand.vmem [shape: f32[8,1], index: 2, kind: input, shape index: {}]   ;;  %s488_s6 = inlined_call_operand.vmem [shape: s32[8,1], index: 6, kind: input, shape index: {}]   ;;  %s489_s3 = inlined_call_operand.vmem [shape: f32[1,8], index: 3, kind: input, shape index: {}]   ;;  %s490_s7 = inlined_call_operand.vmem [shape: s32[1,8], index: 7, kind: input, shape index: {}]   ;;  %s491_s1 = inlined_call_operand.vmem [shape: f32[8,32], index: 1, kind: input, shape index: {}]   ;;  %s492_s4 = inlined_call_operand.vmem [shape: f32[8,1], index: 4, kind: input, shape index: {}]   ;;  %s493_s5 = inlined_call_operand.vmem [shape: f32[1,8], index: 5, kind: input, shape index: {}]   ;;  %s494_s8 = inlined_call_operand.vmem [shape: f32[8,1], index: 8, kind: output, shape index: {}]  }
   0x1   :  { %366 = vmatprep.subr.mxu0 %v401_v0  ;;  %v38_v1 = vld [vmem:[%s486_s0] sm:$0xff]  ;;  %368 = vmatprep.mubr.msk.f32.mxu0 %vm402_vm1, %v401_v0  ;;  %vm142_vm2 = vcmask 64512   ;;  %v138_v19 = vlaneseq }
   0x2   :  { %v33_v2 = vld [vmem:[%s487_s2] sm:$0xff]  ;;  %367 = vmatpush3.xpose.msk.msra.mxu0 %vm39_vm0, %v38_v1  ;;  %379 = vset.pattern.permute.xlu0 %v403_v3 }
   0x3   :  { %118 = vperm.xlu0 %379, %v33_v2   ;;  %371 = vmatprep.subr.mxu1 %v401_v0  ;;  %v35_v4 = vld [vmem:[%s488_s6] sm:$0xff]  ;;  %v139_v20 = vand.u32 127, %v138_v19 }
   0x4   :  { %373 = vmatprep.mubr.msk.f32.mxu1 %vm402_vm1, %v401_v0  ;;  %380 = vset.pattern.permute.xlu1 %v403_v3  ;;  %v357_v6 = vld [vmem:[%s489_s3] ss:$0 sm:$0xff] }
   0x5   :  { %369 = vmatmul.mubr.msk.f32.vlgmr.msra.gmra.mrb[0].mxu0 %vm39_vm0, %v38_v1  ;;  %v358_v9 = vld [vmem:[%s490_s7] ss:$0 sm:$0xff] }
   0x6   :  { %v217_v18 = vld [vmem:[%s491_s1] sm:$0xff] }
   0x7   :  { %131 = vperm.xlu0 %379, %v35_v4   ;;  %372 = vmatpush3.xpose.msk.msra.mxu1 %vm39_vm0, %v217_v18  ;;  %v215_v39 = vld [vmem:[%s492_s4] sm:$0xff] }
   0x8   :  { %v361_v50 = vld [vmem:[%s493_s5] ss:$0 sm:$0xff] }
   0xa   :  { %374 = vmatmul.mubr.msk.f32.vlgmr.msra.gmra.mrb[0].mxu1 %vm39_vm0, %v217_v18 }
  0x82   :  { %v119_v5 = vpop.permute.xlu0 %118 }
  0x83   :  { %v127_v7 = vadd.f32 %v357_v6, %v119_v5 }
  0x86   :  { %v132_v10 = vpop.permute.xlu0 %131 }
  0x87   :  { %vm137_vm3 = vcmp.eq.s32.totalorder %v132_v10, %v358_v9 }
  0xd8   :  { %v112_v8 = vpop.f32.mrb[0].mxu0 }
  0xd9   :  { %v128_v11 = vmul.f32 2.0, %v112_v8  ;;  %v370_v12 = vpop.f32.mrb[1].mxu0 }
  0xdb   :  { %v129_v13 = vsub.f32 %v127_v7, %v128_v11 }
  0xdd   :  { %v140_v14 = vsel %vm137_vm3, %v129_v13, -9.999998e+13  ;;  %v141_v16 = vsel %vm137_vm3, 9.999998e+13, %v129_v13  ;;  %v290_v40 = vpop.f32.mrb[0].mxu1 }
  0xde   :  { %v143_v15 = vsel %vm142_vm2, %v140_v14, -inf  ;;  %v146_v17 = vsel %vm142_vm2, %v141_v16, inf  ;;  %v375_v41 = vpop.f32.mrb[1].mxu1  ;;  %v306_v51 = vmul.f32 2.0, %v290_v40 }
  0xdf   :  { %144 = vmax.xlane.f32.xlu1 %v143_v15 }
  0xe3   :  { %147 = vmin.xlane.f32.xlu1 %v146_v17 }
 0x16c   :  { %v145_v21 = vpop.xlane.xlu1 %144 }
 0x16d   :  { %vm149_vm4 = vcmp.eq.f32.partialorder %v140_v14, %v145_v21  ;;  %v183_v62 = vmax.f32 %v145_v21, 1e-12 }
 0x16e   :  { %v150_v22 = vsel %vm149_vm4, %v139_v20, 8 }
 0x16f   :  { %v151_v24 = vsel %vm142_vm2, %v150_v22, 2147483647  ;;  %vm186_vm11 = vcmp.eq.f32.partialorder %v183_v62, inf  ;;  %v189_v6 = vand.u32 2147483648, %v183_v62  ;;  %vm188_vm13 = vcmp.eq.f32.partialorder %v183_v62, 0.0 }
 0x170   :  { %v148_v23 = vpop.xlane.xlu1 %147  ;;  %v153_v25 = vshra.s32 %v151_v24, 16  ;;  %v152_v31 = vand.u32 65535, %v151_v24 }
 0x171   :  { %vm166_vm5 = vcmp.eq.f32.partialorder %v141_v16, %v148_v23  ;;  %v191_v61 = vmax.f32 %v148_v23, 1e-12 }
 0x172   :  { %v167_v26 = vsel %vm166_vm5, %v139_v20, 8  ;;  %v155_v27 = vcvt.s32.f32 %v153_v25  ;;  %v154_v34 = vcvt.s32.f32 %v152_v31 }
 0x173   :  { %v168_v28 = vsel %vm142_vm2, %v167_v26, 2147483647  ;;  %381 = vrsqrt.f32 %v191_v61  ;;  %vm194_vm10 = vcmp.eq.f32.partialorder %v191_v61, inf  ;;  %v197_v4 = vand.u32 2147483648, %v191_v61 }
 0x174   :  { %v170_v29 = vshra.s32 %v168_v28, 16  ;;  %156 = vmin.xlane.f32.xlu0 %v155_v27  ;;  %v169_v32 = vand.u32 65535, %v168_v28  ;;  %383 = vrsqrt.f32 %v183_v62  ;;  %vm196_vm12 = vcmp.eq.f32.partialorder %v191_v61, 0.0 }
 0x176   :  { %v172_v30 = vcvt.s32.f32 %v170_v29  ;;  %v171_v37 = vcvt.s32.f32 %v169_v32 }
 0x178   :  { %173 = vmin.xlane.f32.xlu1 %v172_v30 }
 0x17d   :  { %v382_v63 = vpop.eup %381 }
 0x17e   :  { %v384_v0 = vpop.eup %383  ;;  %v193_v1 = vmul.f32 %v382_v63, %v191_v61 }
 0x17f   :  { %v185_v2 = vmul.f32 %v384_v0, %v183_v62 }
 0x180   :  { %v195_v3 = vsel %vm194_vm10, %v191_v61, %v193_v1 }
 0x181   :  { %v187_v5 = vsel %vm186_vm11, %v183_v62, %v185_v2  ;;  %v198_v7 = vsel %vm196_vm12, %v197_v4, %v195_v3 }
 0x182   :  { %v190_v8 = vsel %vm188_vm13, %v189_v6, %v187_v5 }
 0x183   :  { %v199_v9 = vmax.f32 %v190_v8, %v198_v7 }
 0x185   :  { %v200_v14 = vsub.f32 %v190_v8, %v199_v9  ;;  %v203_v15 = vsub.f32 %v198_v7, %v199_v9 }
 0x187   :  { %v201_v16 = vmul.f32 1.442695, %v200_v14  ;;  %v204_v17 = vmul.f32 1.442695, %v203_v15 }
 0x201   :  { %v157_v33 = vpop.xlane.xlu0 %156 }
 0x202   :  { %vm158_vm6 = vcmp.eq.f32.partialorder %v155_v27, %v157_v33  ;;  %v163_v43 = vcvt.f32.s32 %v157_v33 }
 0x203   :  { %v159_v35 = vsel %vm158_vm6, %v154_v34, inf }
 0x204   :  { %160 = vmin.xlane.f32.xlu1 %v159_v35  ;;  %v164_v48 = vshll.u32 %v163_v43, 16 }
 0x205   :  { %v174_v36 = vpop.xlane.xlu1 %173 }
 0x206   :  { %vm175_vm7 = vcmp.eq.f32.partialorder %v172_v30, %v174_v36  ;;  %v180_v44 = vcvt.f32.s32 %v174_v36 }
 0x207   :  { %v176_v38 = vsel %vm175_vm7, %v171_v37, inf }
 0x208   :  { %177 = vmin.xlane.f32.xlu1 %v176_v38  ;;  %v181_v49 = vshll.u32 %v180_v44, 16 }
 0x219   :  { %296 = vperm.xlu1 %380, %v215_v39  }
 0x291   :  { %v161_v42 = vpop.xlane.xlu1 %160 }
 0x292   :  { %v162_v45 = vcvt.f32.s32 %v161_v42 }
 0x294   :  { %v165_v52 = vadd.s32 %v164_v48, %v162_v45 }
 0x295   :  { %v178_v46 = vpop.xlane.xlu1 %177 }
 0x296   :  { %v179_v47 = vcvt.f32.s32 %v178_v46  ;;  %vm308_vm9 = vcmp.eq.s32.totalorder %v139_v20, %v165_v52 }
 0x298   :  { %v182_v53 = vadd.s32 %v181_v49, %v179_v47 }
 0x299   :  { %v297_v54 = vpop.permute.xlu1 %296 }
 0x29a   :  { %v305_v55 = vadd.f32 %v361_v50, %v297_v54  ;;  %vm313_vm8 = vcmp.eq.s32.totalorder %v139_v20, %v182_v53 }
 0x29c   :  { %v307_v56 = vsub.f32 %v305_v55, %v306_v51 }
 0x29e   :  { %v314_v57 = vsel %vm313_vm8, %v307_v56, 0.0  ;;  %v309_v58 = vsel %vm308_vm9, %v307_v56, 0.0 }
 0x29f   :  { %v315_v59 = vsel %vm142_vm2, %v314_v57, 0.0  ;;  %v310_v60 = vsel %vm142_vm2, %v309_v58, 0.0  ;;  %vm349_vm2 = vcmask 7168  }
 0x2a0   :  { %316 = vadd.xlane.f32.xlu0 %v315_v59  ;;  %311 = vadd.xlane.f32.xlu1 %v310_v60 }
 0x32d   :  { %v317_v10 = vpop.xlane.xlu0 %316  ;;  %v312_v11 = vpop.xlane.xlu1 %311 }
 0x32e   :  { %v326_v12 = vmax.f32 %v317_v10, 1e-12  ;;  %v318_v13 = vmax.f32 %v312_v11, 1e-12 }
 0x330   :  { %385 = vrsqrt.f32 %v326_v12  ;;  %vm329_vm14 = vcmp.eq.f32.partialorder %v326_v12, inf  ;;  %v332_v21 = vand.u32 2147483648, %v326_v12  ;;  %vm331_vm15 = vcmp.eq.f32.partialorder %v326_v12, 0.0 }
 0x331   :  { %387 = vrsqrt.f32 %v318_v13  ;;  %vm321_vm0 = vcmp.eq.f32.partialorder %v318_v13, inf  ;;  %v324_v24 = vand.u32 2147483648, %v318_v13  ;;  %vm323_vm1 = vcmp.eq.f32.partialorder %v318_v13, 0.0 }
 0x332   :  { %389 = vpow2.f32 %v201_v16 }
 0x333   :  { %391 = vpow2.f32 %v204_v17 }
 0x33a   :  { %v386_v18 = vpop.eup %385 }
 0x33b   :  { %v388_v19 = vpop.eup %387  ;;  %v328_v20 = vmul.f32 %v386_v18, %v326_v12 }
 0x33c   :  { %v320_v22 = vmul.f32 %v388_v19, %v318_v13  ;;  %v390_v29 = vpop.eup %389 }
 0x33d   :  { %v330_v23 = vsel %vm329_vm14, %v326_v12, %v328_v20  ;;  %v392_v32 = vpop.eup %391 }
 0x33e   :  { %v333_v25 = vsel %vm331_vm15, %v332_v21, %v330_v23  ;;  %v322_v26 = vsel %vm321_vm0, %v318_v13, %v320_v22  ;;  %v206_v35 = vadd.f32 %v392_v32, %v390_v29 }
 0x33f   :  { %v325_v27 = vsel %vm323_vm1, %v324_v24, %v322_v26 }
 0x340   :  { %v334_v28 = vmax.f32 %v325_v27, %v333_v25 }
 0x342   :  { %v335_v30 = vsub.f32 %v325_v27, %v334_v28  ;;  %v338_v31 = vsub.f32 %v333_v25, %v334_v28 }
 0x344   :  { %v336_v33 = vmul.f32 1.442695, %v335_v30  ;;  %v339_v34 = vmul.f32 1.442695, %v338_v31 }
 0x346   :  { %393 = vpow2.f32 %v336_v33 }
 0x347   :  { %395 = vpow2.f32 %v339_v34 }
 0x348   :  { %397 = vlog2.f32 %v206_v35 }
 0x350   :  { %v394_v36 = vpop.eup %393 }
 0x351   :  { %v396_v37 = vpop.eup %395 }
 0x352   :  { %v341_v38 = vadd.f32 %v396_v37, %v394_v36  ;;  %v398_v39 = vpop.eup %397 }
 0x353   :  { %v208_v40 = vmul.f32 0.6931472, %v398_v39 }
 0x354   :  { %399 = vrcp.f32 %v341_v38 }
 0x355   :  { %v209_v41 = vadd.f32 %v208_v40, %v199_v9 }
 0x357   :  { %v210_v43 = vsub.f32 %v190_v8, %v209_v41  ;;  %v211_v44 = vsub.f32 %v198_v7, %v209_v41 }
 0x35e   :  { %v400_v42 = vpop.eup %399 }
 0x35f   :  { %v343_v45 = vmul.f32 %v400_v42, %v394_v36  ;;  %v344_v46 = vmul.f32 %v400_v42, %v396_v37 }
 0x361   :  { %v345_v47 = vmul.f32 %v343_v45, %v210_v43  ;;  %v346_v48 = vmul.f32 %v344_v46, %v211_v44 }
 0x363   :  { %v347_v49 = vadd.f32 %v346_v48, %v345_v47 }
 0x365   :  { %v348_v50 = vsub.f32 0.0, %v347_v49 }
 0x367   :  { %350 = vst.msk [vmem:[%s494_s8] sm:$0xff] %vm349_vm2, %v348_v50 }

</bundles_post_ra>
